<compile_context>
chip_gen: v7x
topology: tpu7x:2x2x1
jax: 0.10.0
libtpu: 0.0.40
codegen_flags: <defaults>
</compile_context>

<pallas_src>
import jax
import jax.numpy as jnp
from jax import lax
from jax.experimental import pallas as pl
from jax.experimental.pallas import tpu as pltpu

MAX_LOGSTD = 10.0


# ---------------------------------------------------------------------------
# Kernel 1: GCN layer 1  ->  H = ReLU(A @ (X W1) + b1)      (H stored in bf16)
# grid = (row blocks, K reduction blocks); A streamed (tm, tk) bf16;
# X/W1/b1 resident via constant index maps; f32 VMEM accumulator.
# ---------------------------------------------------------------------------
def gcn_layer1_kernel(x_ref, a_ref, w1_ref, b1_ref, h_ref, acc_ref):
    k = pl.program_id(1)

    @pl.when(k == 0)
    def _():
        acc_ref[...] = jnp.zeros_like(acc_ref)

    xw = jnp.dot(x_ref[...].astype(jnp.bfloat16),
                 w1_ref[...].astype(jnp.bfloat16),
                 preferred_element_type=jnp.float32)                 # [tk, H]
    acc_ref[...] += jnp.dot(a_ref[...], xw.astype(jnp.bfloat16),
                            preferred_element_type=jnp.float32)      # [tm, H]

    @pl.when(k == pl.num_programs(1) - 1)
    def _():
        h = jnp.maximum(acc_ref[...] + b1_ref[...], 0.0)
        h_ref[...] = h.astype(h_ref.dtype)


def gcn_layer1(x, a_bf16, w1, b1, *, tm=256, tk=256):
    n, f = x.shape
    hidden = w1.shape[1]
    tm = min(tm, n)
    tk = min(tk, n)
    grid = (pl.cdiv(n, tm), pl.cdiv(n, tk))
    return pl.pallas_call(
        gcn_layer1_kernel,
        out_shape=jax.ShapeDtypeStruct((n, hidden), jnp.bfloat16),
        grid_spec=pltpu.PrefetchScalarGridSpec(
            num_scalar_prefetch=0,
            grid=grid,
            in_specs=[
                pl.BlockSpec((tk, f), lambda i, k: (k, 0)),        # X rows (K)
                pl.BlockSpec((tm, tk), lambda i, k: (i, k)),       # A tile
                pl.BlockSpec((f, hidden), lambda i, k: (0, 0)),    # W1 resident
                pl.BlockSpec((1, hidden), lambda i, k: (0, 0)),    # b1 resident
            ],
            out_specs=pl.BlockSpec((tm, hidden), lambda i, k: (i, 0)),
            scratch_shapes=[pltpu.VMEM((tm, hidden), jnp.float32)]),
        compiler_params=pltpu.CompilerParams(
            dimension_semantics=("parallel", "arbitrary")),
    )(x, a_bf16, w1, b1)


# ---------------------------------------------------------------------------
# Kernel 2: fused GCN heads + clamp + reparametrize.
#   [mu | logstd] = A @ (H Wh) + bh     (single A-contraction, Wh = [Wmu|Wsig])
#   logstd = min(logstd, MAX_LOGSTD)
#   z      = mu + eps * exp(logstd)     (z emitted in bf16 for the decoder)
# ---------------------------------------------------------------------------
def gcn_layer2_kernel(h_ref, a_ref, wh_ref, bh_ref, eps_ref,
                      z_ref, musig_ref, acc_ref):
    k = pl.program_id(1)

    @pl.when(k == 0)
    def _():
        acc_ref[...] = jnp.zeros_like(acc_ref)

    hw = jnp.dot(h_ref[...], wh_ref[...].astype(jnp.bfloat16),
                 preferred_element_type=jnp.float32)                 # [tk, 2Z]
    acc_ref[...] += jnp.dot(a_ref[...], hw.astype(jnp.bfloat16),
                            preferred_element_type=jnp.float32)      # [tm, 2Z]

    @pl.when(k == pl.num_programs(1) - 1)
    def _():
        heads = acc_ref[...] + bh_ref[...]                           # [tm, 2Z]
        z_dim = eps_ref.shape[1]
        # clamp(max=MAX_LOGSTD) applies only to the logstd half of the slab
        col = lax.broadcasted_iota(jnp.int32, heads.shape, 1)
        musig = jnp.where(col < z_dim, heads, jnp.minimum(heads, MAX_LOGSTD))
        musig_ref[...] = musig                        # packed [mu | logstd]
        mu = musig[:, :z_dim]
        logstd = musig[:, z_dim:]
        # reparametrize (training-mode forward: noise always added, per spec)
        z_ref[...] = (mu + eps_ref[...] * jnp.exp(logstd)).astype(z_ref.dtype)


def gcn_layer2(h_bf16, a_bf16, w_heads, b_heads, eps, *, tm=256, tk=256):
    n, hidden = h_bf16.shape
    z_dim = eps.shape[1]
    tm = min(tm, n)
    tk = min(tk, n)
    grid = (pl.cdiv(n, tm), pl.cdiv(n, tk))
    return pl.pallas_call(
        gcn_layer2_kernel,
        out_shape=(
            jax.ShapeDtypeStruct((n, z_dim), jnp.bfloat16),      # z (decoder in)
            jax.ShapeDtypeStruct((n, 2 * z_dim), jnp.float32),   # [mu | logstd]
        ),
        grid_spec=pltpu.PrefetchScalarGridSpec(
            num_scalar_prefetch=0,
            grid=grid,
            in_specs=[
                pl.BlockSpec((tk, hidden), lambda i, k: (k, 0)),       # H rows (K)
                pl.BlockSpec((tm, tk), lambda i, k: (i, k)),           # A tile
                pl.BlockSpec((hidden, 2 * z_dim), lambda i, k: (0, 0)),# Wh resident
                pl.BlockSpec((1, 2 * z_dim), lambda i, k: (0, 0)),     # bh resident
                pl.BlockSpec((tm, z_dim), lambda i, k: (i, 0)),        # eps rows
            ],
            out_specs=(
                pl.BlockSpec((tm, z_dim), lambda i, k: (i, 0)),
                pl.BlockSpec((tm, 2 * z_dim), lambda i, k: (i, 0)),
            ),
            scratch_shapes=[pltpu.VMEM((tm, 2 * z_dim), jnp.float32)]),
        compiler_params=pltpu.CompilerParams(
            dimension_semantics=("parallel", "arbitrary")),
    )(h_bf16, a_bf16, w_heads, b_heads, eps)


# ---------------------------------------------------------------------------
# Kernel 3: inner-product decoder over all pairs, tiled 2-D parallel grid.
#   pred[i, j] = sigmoid(z_i . z_j) = 0.5 * tanh(0.5 * (z_i . z_j)) + 0.5
# dot_general contracts the last axis of both z tiles (no transpose
# materialized); single EUP transcendental per element; bf16 output halves
# the dominant N^2 HBM writeback.
# ---------------------------------------------------------------------------
def decoder_kernel(zi_ref, zj_ref, pred_ref):
    logits = lax.dot_general(
        zi_ref[...], zj_ref[...],
        dimension_numbers=(((1,), (1,)), ((), ())),
        preferred_element_type=jnp.float32)                          # [tm, tn]
    pred_ref[...] = (0.5 * jnp.tanh(0.5 * logits) + 0.5).astype(pred_ref.dtype)


def decoder_forward(z_bf16, *, tm=512, tn=512):
    n, z_dim = z_bf16.shape
    tm = min(tm, n)
    tn = min(tn, n)
    grid = (pl.cdiv(n, tm), pl.cdiv(n, tn))
    return pl.pallas_call(
        decoder_kernel,
        # NOTE: probabilities emitted in bf16 (downstream consumers beware).
        out_shape=jax.ShapeDtypeStruct((n, n), jnp.bfloat16),
        grid_spec=pltpu.PrefetchScalarGridSpec(
            num_scalar_prefetch=0,
            grid=grid,
            in_specs=[
                pl.BlockSpec((tm, z_dim), lambda i, j: (i, 0)),  # z row tiles
                pl.BlockSpec((tn, z_dim), lambda i, j: (j, 0)),  # z col tiles
            ],
            out_specs=pl.BlockSpec((tm, tn), lambda i, j: (i, j)),
        ),
        compiler_params=pltpu.CompilerParams(
            dimension_semantics=("parallel", "parallel")),
    )(z_bf16, z_bf16)


# ---------------------------------------------------------------------------
# Full forward (glue JAX around the three kernels)
# ---------------------------------------------------------------------------
def vgae_forward(x, a_norm, params, eps, *, enc_tile=256, dec_tile=512):
    # fuse the two encoder heads into a single [H, 2Z] weight / [1, 2Z] bias
    w_heads = jnp.concatenate([params["w_mu"], params["w_sigma"]], axis=1)
    b_heads = jnp.concatenate([params["b_mu"], params["b_sigma"]], axis=1)
    a_bf16 = a_norm.astype(jnp.bfloat16)   # halve footprint of the largest input

    h = gcn_layer1(x, a_bf16, params["w1"], params["b1"],
                   tm=enc_tile, tk=enc_tile)
    z_bf16, musig = gcn_layer2(h, a_bf16, w_heads, b_heads, eps,
                               tm=enc_tile, tk=enc_tile)

    z_dim = eps.shape[1]
    mu = musig[:, :z_dim]
    sigma = musig[:, z_dim:]               # clamped log-std (module's naming)

    pred = decoder_forward(z_bf16, tm=dec_tile, tn=dec_tile)
    return pred, mu, sigma


def normalized_adjacency(edge_index, num_nodes):
    """Symmetrically-normalized adjacency with self loops (GCN norm). Glue JAX."""
    src, dst = edge_index[0], edge_index[1]
    A = jnp.zeros((num_nodes, num_nodes), jnp.float32)
    A = A.at[src, dst].set(1.0)
    A = A.at[dst, src].set(1.0)
    # guard against pre-existing self loops: force the diagonal to exactly 1
    eye = jnp.eye(num_nodes, dtype=bool)
    A = jnp.where(eye, 1.0, A)
    deg = A.sum(axis=1)
    d_inv_sqrt = 1.0 / jnp.sqrt(deg)
    return A * d_inv_sqrt[:, None] * d_inv_sqrt[None, :]


def init_params(key, in_feats, hidden, latent):
    k1, k2, k3 = jax.random.split(key, 3)

    def glorot(k, fan_in, fan_out):
        s = jnp.sqrt(6.0 / (fan_in + fan_out))
        return jax.random.uniform(k, (fan_in, fan_out), jnp.float32, -s, s)

    return {
        "w1": glorot(k1, in_feats, hidden),
        "b1": jnp.zeros((1, hidden), jnp.float32),
        "w_mu": glorot(k2, hidden, latent),
        "b_mu": jnp.zeros((1, latent), jnp.float32),
        "w_sigma": glorot(k3, hidden, latent),
        "b_sigma": jnp.zeros((1, latent), jnp.float32),
    }


def kl_loss(mu, sigma):
    # matches the module's kl_loss (sigma is the clamped log-std)
    return -0.5 * jnp.mean(
        jnp.sum(1.0 + 2.0 * sigma - mu ** 2 - jnp.exp(sigma) ** 2, axis=1))


if __name__ == "__main__":
    # N=512 -> encoder grid (2, 2) exercises the K-reduction / pl.when paths;
    # decoder runs one 512x512 tile.
    N, F_IN, HIDDEN, LATENT = 512, 16, 32, 16

    key = jax.random.PRNGKey(0)
    k_x, k_p, k_eps = jax.random.split(key, 3)

    x = jax.random.normal(k_x, (N, F_IN), jnp.float32)
    # simple ring graph edge_index [2, E]
    src = jnp.arange(N, dtype=jnp.int32)
    dst = (src + 1) % N
    edge_index = jnp.stack([src, dst], axis=0)

    a_norm = normalized_adjacency(edge_index, N)
    params = init_params(k_p, F_IN, HIDDEN, LATENT)
    # randn_like(sigma) for the reparametrization trick (deterministic here)
    eps = jax.random.normal(k_eps, (N, LATENT), jnp.float32)

    pred, mu, sigma = vgae_forward(x, a_norm, params, eps)
    jax.block_until_ready((pred, mu, sigma))

    # sanity: also evaluate the kl_loss path on kernel outputs
    _ = jax.block_until_ready(kl_loss(mu, sigma))

    assert pred.shape == (N, N)
    assert mu.shape == (N, LATENT) and sigma.shape == (N, LATENT)
    print("KERNEL_OK")
</pallas_src>

<mosaic_0001>
module attributes {stable_mosaic.version = 11 : i64} {
  func.func @gcn_layer1_kernel(%arg0: i32, %arg1: i32, %arg2: memref<256x16xf32, #tpu.memory_space<vmem>>, %arg3: memref<256x256xbf16, #tpu.memory_space<vmem>>, %arg4: memref<16x32xf32, #tpu.memory_space<vmem>>, %arg5: memref<1x32xf32, #tpu.memory_space<vmem>>, %arg6: memref<256x32xbf16, #tpu.memory_space<vmem>>, %arg7: memref<256x32xf32, #tpu.memory_space<vmem>>) attributes {dimension_semantics = [#tpu.dimension_semantics<parallel>, #tpu.dimension_semantics<arbitrary>], iteration_bounds = array<i64: 2, 2>, scalar_prefetch = 0 : i64, scratch_operands = 1 : i64, tpu.core_type = #tpu.core_type<tc>, window_params = [{transform_indices = @transform_0, window_bounds = array<i64: 256, 16>}, {transform_indices = @transform_1, window_bounds = array<i64: 256, 256>}, {pipeline_mode = #tpu.pipeline_mode<synchronous>, transform_indices = @transform_2, window_bounds = array<i64: 16, 32>}, {pipeline_mode = #tpu.pipeline_mode<synchronous>, transform_indices = @transform_3, window_bounds = array<i64: 1, 32>}, {transform_indices = @transform_4, window_bounds = array<i64: 256, 32>}]} {
    %c0_i32 = arith.constant 0 : i32
    %0 = arith.cmpi eq, %arg1, %c0_i32 : i32
    %1 = arith.extui %0 : i1 to i32
    %c0_i32_0 = arith.constant 0 : i32
    %2 = arith.cmpi ne, %1, %c0_i32_0 : i32
    scf.if %2 {
      %cst_12 = arith.constant 0.000000e+00 : f32
      %17 = vector.broadcast %cst_12 : f32 to vector<256x32xf32>
      %c0_13 = arith.constant 0 : index
      %c0_14 = arith.constant 0 : index
      %18 = vector.load %arg7[%c0_13, %c0_14] : memref<256x32xf32, #tpu.memory_space<vmem>>, vector<256x32xf32>
      tpu.vector_store %arg7[%c0_13, %c0_14], %17 {strides = array<i32>} : memref<256x32xf32, #tpu.memory_space<vmem>>, vector<256x32xf32>,
    } else {
    }
    %c0 = arith.constant 0 : index
    %c0_1 = arith.constant 0 : index
    %3 = vector.load %arg2[%c0, %c0_1] : memref<256x16xf32, #tpu.memory_space<vmem>>, vector<256x16xf32>
    %4 = arith.truncf %3 : vector<256x16xf32> to vector<256x16xbf16>
    %c0_2 = arith.constant 0 : index
    %c0_3 = arith.constant 0 : index
    %5 = vector.load %arg4[%c0_2, %c0_3] : memref<16x32xf32, #tpu.memory_space<vmem>>, vector<16x32xf32>
    %6 = arith.truncf %5 : vector<16x32xf32> to vector<16x32xbf16>
    %cst = arith.constant dense<0.000000e+00> : vector<256x32xf32>
    %7 = tpu.matmul %4, %6, %cst {dimension_numbers = #tpu.dot_dimension_numbers<[1], [0], [0], [1], [0, 0, 1, 1], [], []>} : vector<256x16xbf16>, vector<16x32xbf16>, vector<256x32xf32> -> vector<256x32xf32>
    %c0_4 = arith.constant 0 : index
    %c0_5 = arith.constant 0 : index
    %8 = vector.load %arg7[%c0_4, %c0_5] : memref<256x32xf32, #tpu.memory_space<vmem>>, vector<256x32xf32>
    %c0_6 = arith.constant 0 : index
    %c0_7 = arith.constant 0 : index
    %9 = vector.load %arg3[%c0_6, %c0_7] : memref<256x256xbf16, #tpu.memory_space<vmem>>, vector<256x256xbf16>
    %10 = arith.truncf %7 : vector<256x32xf32> to vector<256x32xbf16>
    %cst_8 = arith.constant dense<0.000000e+00> : vector<256x32xf32>
    %11 = tpu.matmul %9, %10, %cst_8 {dimension_numbers = #tpu.dot_dimension_numbers<[1], [0], [0], [1], [0, 0, 1, 1], [], []>} : vector<256x256xbf16>, vector<256x32xbf16>, vector<256x32xf32> -> vector<256x32xf32>
    %12 = arith.addf %8, %11 : vector<256x32xf32>
    %c0_9 = arith.constant 0 : index
    %c0_10 = arith.constant 0 : index
    %13 = vector.load %arg7[%c0_9, %c0_10] : memref<256x32xf32, #tpu.memory_space<vmem>>, vector<256x32xf32>
    tpu.vector_store %arg7[%c0_9, %c0_10], %12 {strides = array<i32>} : memref<256x32xf32, #tpu.memory_space<vmem>>, vector<256x32xf32>,
    %c1_i32 = arith.constant 1 : i32
    %14 = arith.cmpi eq, %arg1, %c1_i32 : i32
    %15 = arith.extui %14 : i1 to i32
    %c0_i32_11 = arith.constant 0 : i32
    %16 = arith.cmpi ne, %15, %c0_i32_11 : i32
    scf.if %16 {
      %c0_12 = arith.constant 0 : index
      %c0_13 = arith.constant 0 : index
      %17 = vector.load %arg7[%c0_12, %c0_13] : memref<256x32xf32, #tpu.memory_space<vmem>>, vector<256x32xf32>
      %c0_14 = arith.constant 0 : index
      %c0_15 = arith.constant 0 : index
      %18 = vector.load %arg5[%c0_14, %c0_15] : memref<1x32xf32, #tpu.memory_space<vmem>>, vector<1x32xf32>
      %19 = vector.broadcast %18 : vector<1x32xf32> to vector<256x32xf32>
      %20 = arith.addf %17, %19 : vector<256x32xf32>
      %cst_16 = arith.constant 0.000000e+00 : f32
      %21 = vector.broadcast %cst_16 : f32 to vector<256x32xf32>
      %22 = arith.maximumf %20, %21 : vector<256x32xf32>
      %23 = arith.truncf %22 : vector<256x32xf32> to vector<256x32xbf16>
      %c0_17 = arith.constant 0 : index
      %c0_18 = arith.constant 0 : index
      %24 = vector.load %arg6[%c0_17, %c0_18] : memref<256x32xbf16, #tpu.memory_space<vmem>>, vector<256x32xbf16>
      tpu.vector_store %arg6[%c0_17, %c0_18], %23 {strides = array<i32>} : memref<256x32xbf16, #tpu.memory_space<vmem>>, vector<256x32xbf16>,
    } else {
    }
    return
  }
  func.func @transform_0(%arg0: i32, %arg1: i32) -> (i32, i32) {
    %c0_i32 = arith.constant 0 : i32
    %c0_i32_0 = arith.constant 0 : i32
    return %arg1, %c0_i32 : i32, i32
  }
  func.func @transform_1(%arg0: i32, %arg1: i32) -> (i32, i32) {
    %c0_i32 = arith.constant 0 : i32
    return %arg0, %arg1 : i32, i32
  }
  func.func @transform_2(%arg0: i32, %arg1: i32) -> (i32, i32) {
    %c0_i32 = arith.constant 0 : i32
    %c0_i32_0 = arith.constant 0 : i32
    %c0_i32_1 = arith.constant 0 : i32
    return %c0_i32, %c0_i32_0 : i32, i32
  }
  func.func @transform_3(%arg0: i32, %arg1: i32) -> (i32, i32) {
    %c0_i32 = arith.constant 0 : i32
    %c0_i32_0 = arith.constant 0 : i32
    %c0_i32_1 = arith.constant 0 : i32
    return %c0_i32, %c0_i32_0 : i32, i32
  }
  func.func @transform_4(%arg0: i32, %arg1: i32) -> (i32, i32) {
    %c0_i32 = arith.constant 0 : i32
    %c0_i32_0 = arith.constant 0 : i32
    return %arg0, %c0_i32 : i32, i32
  }
}

</mosaic_0001>

<bundles_post_ra>
// kernel: tpu_custom_call.1
= control target key start
LH: loop header
LB: loop body
LE: loop exit
PB: predicated region body
PF: predicated region fallthrough
CT: control target
= control target key end

     0   :  { %9 = vsyncpa [#allocation4], 0  ;;  %s2361_s0 = inlined_call_operand.vmem [shape: f32[512,16], index: 0, kind: input, shape index: {}]   ;;  %s2362_s1 = inlined_call_operand.hbm [shape: bf16[512,512], index: 1, kind: input, shape index: {}]   ;;  %s2363_s2 = inlined_call_operand.vmem [shape: f32[16,32], index: 2, kind: input, shape index: {}]   ;;  %s2364_s3 = inlined_call_operand.vmem [shape: f32[1,32], index: 3, kind: input, shape index: {}]   ;;  %s2365_s4 = inlined_call_operand.vmem [shape: bf16[512,32], index: 4, kind: output, shape index: {}]  }
   0x1   :  { %11 = vsyncpa [#allocation4 + $0x1], 0  ;;  %s1950_s15 = smov 0   ;;  %s1952_s16 = smov 0  }
   0x2   :  { %s1954_s17 = smov 0   ;;  %s1956_s18 = smov 0  }
   0x3   :  { %s1958_s19 = smov 0   ;;  %s1960_s20 = smov 0  }
   0x4   :  { %s1962_s21 = smov 0   ;;  %s1964_s22 = smov 0  }
   0x5 LB: > { %s1387_s23 = sadd.s32 4294967295, %s1918_s22   ;;  %s26_s24 = sadd.s32 1, %s1910_s20  ;;  %s1918_s22 = sphi %s1964_s22, %s17_s22   ;;  %s1914_s21 = sphi %s1962_s21, %s2378_s21   ;;  %s1910_s20 = sphi %s1960_s20, %s2377_s20   ;;  %s1906_s19 = sphi %s1958_s19, %s2376_s19   ;;  %s1902_s18 = sphi %s1956_s18, %s2375_s18   ;;  %s1898_s17 = sphi %s1954_s17, %s2374_s17   ;;  %s1894_s16 = sphi %s1952_s16, %s2373_s16   ;;  %s1890_s15 = sphi %s1950_s15, %s2372_s15  }
   0x6   : > { %p27_p0 = scmp.ge.s32.totalorder %s26_s24, 2  ;;  %s29_s25 = sadd.s32 1, %s1914_s21 }
   0x7   : > { %s64_s26 = sadd.s32 1, %s1898_s17  ;;  %p71_p1 = scmp.ne.s32.totalorder %s1898_s17, %s1894_s16 }
   0x8   : > { %s2380_s24 = smov (%p27_p0, %s26_s24), 0  ;;  %s2382_s25 = smov (!%p27_p0, %s29_s25), %s1914_s21 }
   0x9   : > { %2367 = sst [smem:[#allocation6_spill]] %s2380_s24  ;;  %s60_s27 = ssub.s32 %s1910_s20, %s2380_s24 }
   0xa   : > { %p72_p2 = scmp.eq.s32.totalorder %s1918_s22, 0  ;;  %p31_p3 = scmp.ge.s32.totalorder %s2382_s25, 2 }
   0xb   : > { %p77_p4 = scmp.ne.s32.totalorder %s1894_s16, %s1890_s15  ;;  %p78_p6 = scmp.eq.s32.totalorder %s1387_s23, 0 }
   0xc   : > { %p2001_p5 = por %p72_p2, %p71_p1  ;;  %s2384_s25 = smov (%p31_p3, %s2382_s25), 0 }
   0xd   : > { %p2007_p7 = por %p78_p6, %p77_p4  ;;  %s59_s30 = ssub.s32 %s1914_s21, %s2384_s25 }
   0xe   : > { %p1705_p8 = scmp.lt.s32.totalorder %s1918_s22, 4  ;;  %s61_s5 = sor.u32 %s60_s27, %s59_s30 }
   0xf   : > { %s184_s6 = sand.u32 1, %s1898_s17   ;;  %p62_p9 = scmp.eq.s32.totalorder %s61_s5, 0 }
  0x10   : > { %s1391_s7 = sshll.u32 %s184_s6, 8  ;;  %s1393_s8 = sshll.u32 %s1910_s20, 1 }
  0x11   : > { %s2017_s9 = scalar_select %p62_p9, %s1898_s17, %s64_s26  }
  0x12   : > { %s1487_s10 = sshll.u32 %s1914_s21, 7  ;;  %s188_s12 = scalar_lea.vmem [#allocation3], %s1391_s7 }
  0x13   : > { %s195_s11 = sadd.s32 %s1487_s10, %s1393_s8  ;;  %s198_s13 = sshll.u32 %s188_s12, 4  ;;  %s2020_s13 = int_to_ptr.vmem [resolvable:$true] %s198_s13 }
  0x14   : > { %s1395_s14 = sshll.u32 %s195_s11, 6  ;;  %p2031_p10 = pnand %p1705_p8, %p2001_p5 }
  0x15   : > { %s2025_s24 = scalar_lea.hbm %s2362_s1, %s1395_s14  ;;  %s2035_s27 = scalar_lea.sflag [#allocation4], %s184_s6 }
  0x16   : > { %s1822_s30 = scalar_lea.hbm %s2025_s24, 4096  ;;  %p1824_p12 = pneg %p2031_p10 }
  0x17   : > { %p1823_p11 = scmp.ne.s32.totalorder %s2025_s24, %s1822_s30  ;;  %s1827_s7 = scalar_lea.hbm %s2362_s1, 16384 }
  0x18   : > { %p1828_p1 = scmp.lt.u32.totalorder %s2025_s24, %s2362_s1  ;;  %p1829_p2 = scmp.lt.u32.totalorder %s1827_s7, %s1822_s30 }
  0x19   : > { %p1825_p13 = pnand %p1824_p12, %p1823_p11  ;;  %p1831_p4 = scmp.lt.u32.totalorder %s1822_s30, %s2025_s24 }
  0x1a   : > { %p1830_p3 = por %p1829_p2, %p1828_p1 }
  0x1b   : > { %p1826_p0 = pneg %p1825_p13 }
  0x1c   : > { %p1832_p5 = por %p1831_p4, %p1830_p3 }
  0x1e   : > { %p1833_p6 = pnand %p1832_p5, %p1826_p0 }
  0x20   : > { %1836 = shalt.err (!%p1833_p6)
}
  0x21   : > { %s1837_s6 = scalar_lea.vmem %s2020_s13, 4096  ;;  %s1920_s11 = smov [#allocation3]  }
  0x22   : > { %p1838_p8 = scmp.ne.s32.totalorder %s2020_s13, %s1837_s6  ;;  %s1842_s12 = sshll.u32 %s1920_s11, 4  ;;  %s1843_s12 = int_to_ptr.vmem [resolvable:$false] %s1842_s12 }
  0x23   : > { %s1844_s14 = scalar_lea.vmem %s1843_s12, 8192  ;;  %p1845_p13 = scmp.lt.s32.totalorder %s2020_s13, %s1843_s12 }
  0x24   : > { %p1840_p9 = pnand %p1838_p8, %p1824_p12  ;;  %p1846_p1 = scmp.lt.s32.totalorder %s1844_s14, %s1837_s6 }
  0x26   : > { %p1841_p11 = pneg %p1840_p9  ;;  %p1847_p2 = por %p1846_p1, %p1845_p13 }
  0x28   : > { %p1848_p3 = pnand %p1847_p2, %p1841_p11 }
  0x2a   : > { %1851 = shalt.err (!%p1848_p3)
}
  0x2b   : > { %s1921_s15 = smov 256   ;;  %s1922_s23 = smov 128  }
  0x2c   : > { %s1923_s30 = smov 8   ;;  %p1396_p12 = scmp.ge.s32.totalorder %s1918_s22, 1 }
  0x2d   : > { %1704 = dma.hbm_to_vmem [thread:$0]  (!%p2031_p10), %s2025_s24, 4096, %s2020_s13, %s2035_s27, %s1921_s15, %s1922_s23, %s1923_s30  }
  0x2e   : > { %p206_p0 = scmp.lt.s32.totalorder %s1918_s22, 5 }
  0x30   : > { %p207_p4 = pnand %p1396_p12, %p206_p0 }
  0x31   : > { %s212_s28 = sand.u32 (!%p207_p4), 1, %s1894_s16  }
  0x32   : > { %210 = sbr.rel (%p207_p4) target bundleno = 681 (0x2a9), region = 36  ;;  %s1397_s5 = sshll.u32 (!%p207_p4), %s212_s28, 8 }
  0x33   : > { %s213_s7 = scalar_lea.sflag (!%p207_p4), [#allocation4], %s212_s28  ;;  %s2066_s8 = scalar_lea.vmem (!%p207_p4), [#allocation3], %s1397_s5 }
  0x39   : > { %1885 = dma.done.wait (%p2007_p7), %s213_s7, 4096  }
  0x3a   : > { %1887 = vsyncadd (%p2007_p7), %s213_s7, 4294963200  ;;  %s1398_s26 = sshll.u32 %s1902_s18, 5  ;;  %s1400_s24 = sshll.u32 %s1906_s19, 5 }
  0x3b   : > { %p247_p10 = scmp.lt.s32.totalorder %s1398_s26, 63  ;;  %p255_p5 = scmp.lt.s32.totalorder %s1400_s24, 63 }
  0x3c   : > { %p1402_p7 = scmp.ne.s32.totalorder %s1902_s18, 0 }
  0x3d   : > { %s2386_s26 = smov (!%p247_p10, %s1398_s26), 63  ;;  %s2388_s24 = smov (!%p255_p5, %s1400_s24), 63 }
  0x3e   : > { %s1399_s13 = sshll.u32 %s2386_s26, 3  ;;  %s1401_s11 = sshll.u32 %s2388_s24, 2  ;;  %vm265_vm0 = vcmask (!%p1402_p7), 261120   ;;  %v1924_v0 = vmov (!%p1402_p7), 0.0  }
  0x3f   : > { %s2077_s6 = scalar_lea.vmem %s2361_s0, %s1399_s13  ;;  %s2082_s29 = scalar_lea.vmem %s2365_s4, %s1401_s11  ;;  %266 = vst.msk [vmem:[#allocation2] sm:$0xff] (!%p1402_p7), %vm265_vm0, %v1924_v0  ;;  %267 = vst.msk [vmem:[#allocation2 + $0x8] sm:$0xff] (!%p1402_p7), %vm265_vm0, %v1924_v0 }
  0x40   : > { %264 = sbr.rel (%p1402_p7) target bundleno = 79 (0x4f), region = 44  ;;  %268 = vst.msk [vmem:[#allocation2 + $0x10] sm:$0xff] (!%p1402_p7), %vm265_vm0, %v1924_v0  ;;  %269 = vst.msk [vmem:[#allocation2 + $0x18] sm:$0xff] (!%p1402_p7), %vm265_vm0, %v1924_v0 }
  0x41   : > { %270 = vst.msk [vmem:[#allocation2 + $0x20] sm:$0xff] (!%p1402_p7), %vm265_vm0, %v1924_v0  ;;  %271 = vst.msk [vmem:[#allocation2 + $0x28] sm:$0xff] (!%p1402_p7), %vm265_vm0, %v1924_v0 }
  0x42   : > { %272 = vst.msk [vmem:[#allocation2 + $0x30] sm:$0xff] (!%p1402_p7), %vm265_vm0, %v1924_v0  ;;  %273 = vst.msk [vmem:[#allocation2 + $0x38] sm:$0xff] (!%p1402_p7), %vm265_vm0, %v1924_v0 }
  0x43   : > { %274 = vst.msk [vmem:[#allocation2 + $0x40] sm:$0xff] (!%p1402_p7), %vm265_vm0, %v1924_v0  ;;  %275 = vst.msk [vmem:[#allocation2 + $0x48] sm:$0xff] (!%p1402_p7), %vm265_vm0, %v1924_v0 }
  0x44   : > { %276 = vst.msk [vmem:[#allocation2 + $0x50] sm:$0xff] (!%p1402_p7), %vm265_vm0, %v1924_v0  ;;  %277 = vst.msk [vmem:[#allocation2 + $0x58] sm:$0xff] (!%p1402_p7), %vm265_vm0, %v1924_v0 }
  0x45   : > { %278 = vst.msk [vmem:[#allocation2 + $0x60] sm:$0xff] (!%p1402_p7), %vm265_vm0, %v1924_v0  ;;  %279 = vst.msk [vmem:[#allocation2 + $0x68] sm:$0xff] (!%p1402_p7), %vm265_vm0, %v1924_v0 }
  0x46   : > { %280 = vst.msk [vmem:[#allocation2 + $0x70] sm:$0xff] (!%p1402_p7), %vm265_vm0, %v1924_v0  ;;  %281 = vst.msk [vmem:[#allocation2 + $0x78] sm:$0xff] (!%p1402_p7), %vm265_vm0, %v1924_v0 }
  0x47   : > { %282 = vst.msk [vmem:[#allocation2 + $0x80] sm:$0xff] %vm265_vm0, %v1924_v0  ;;  %283 = vst.msk [vmem:[#allocation2 + $0x88] sm:$0xff] %vm265_vm0, %v1924_v0 }
  0x48   : > { %284 = vst.msk [vmem:[#allocation2 + $0x90] sm:$0xff] %vm265_vm0, %v1924_v0  ;;  %285 = vst.msk [vmem:[#allocation2 + $0x98] sm:$0xff] %vm265_vm0, %v1924_v0 }
  0x49   : > { %286 = vst.msk [vmem:[#allocation2 + $0xa0] sm:$0xff] %vm265_vm0, %v1924_v0  ;;  %287 = vst.msk [vmem:[#allocation2 + $0xa8] sm:$0xff] %vm265_vm0, %v1924_v0 }
  0x4a   : > { %288 = vst.msk [vmem:[#allocation2 + $0xb0] sm:$0xff] %vm265_vm0, %v1924_v0  ;;  %289 = vst.msk [vmem:[#allocation2 + $0xb8] sm:$0xff] %vm265_vm0, %v1924_v0 }
  0x4b   : > { %290 = vst.msk [vmem:[#allocation2 + $0xc0] sm:$0xff] %vm265_vm0, %v1924_v0  ;;  %291 = vst.msk [vmem:[#allocation2 + $0xc8] sm:$0xff] %vm265_vm0, %v1924_v0 }
  0x4c   : > { %292 = vst.msk [vmem:[#allocation2 + $0xd0] sm:$0xff] %vm265_vm0, %v1924_v0  ;;  %293 = vst.msk [vmem:[#allocation2 + $0xd8] sm:$0xff] %vm265_vm0, %v1924_v0 }
  0x4d   : > { %294 = vst.msk [vmem:[#allocation2 + $0xe0] sm:$0xff] %vm265_vm0, %v1924_v0  ;;  %295 = vst.msk [vmem:[#allocation2 + $0xe8] sm:$0xff] %vm265_vm0, %v1924_v0 }
  0x4e   : > { %296 = vst.msk [vmem:[#allocation2 + $0xf0] sm:$0xff] %vm265_vm0, %v1924_v0  ;;  %297 = vst.msk [vmem:[#allocation2 + $0xf8] sm:$0xff] %vm265_vm0, %v1924_v0 }
  0x4f PF: > { %v346_v1 = vld [vmem:[%s2363_s2] sm:$0xff]  ;;  %v347_v2 = vld [vmem:[%s2363_s2 + $0x8] sm:$0xff]  ;;  %vm349_vm1 = vcmask 130048   ;;  %v300_v6 = vld [vmem:[%s2077_s6 + $0x10] sm:$0xff]  ;;  %vm992_vm2 = vcmask 261120   ;;  %p1451_p6 = scmp.ne.s32.totalorder %s1902_s18, 1 }
  0x50   : > { %v298_v3 = vld [vmem:[%s2077_s6] sm:$0xff]  ;;  %v348_v4 = vpack.c.bf16 %v347_v2, %v346_v1  ;;  %v299_v5 = vld [vmem:[%s2077_s6 + $0x8] sm:$0xff]  ;;  %v301_v7 = vld [vmem:[%s2077_s6 + $0x18] sm:$0xff]  ;;  %vm1260_vm3 = vcmask (!%p1451_p6), 257024  }
  0x51   : > { %v330_v8 = vpack.c.bf16 %v299_v5, %v298_v3  ;;  %v302_v9 = vld [vmem:[%s2077_s6 + $0x20] sm:$0xff]  ;;  %v303_v10 = vld [vmem:[%s2077_s6 + $0x28] sm:$0xff]  ;;  %v331_v11 = vpack.c.bf16 %v301_v7, %v300_v6  ;;  %v304_v13 = vld [vmem:[%s2077_s6 + $0x30] sm:$0xff] }
  0x52   : > { %1649 = vmatprep.subr.bf16.mxu0 %v348_v4  ;;  %v332_v12 = vpack.c.bf16 %v303_v10, %v302_v9  ;;  %v305_v14 = vld [vmem:[%s2077_s6 + $0x38] sm:$0xff]  ;;  %v306_v15 = vld [vmem:[%s2077_s6 + $0x40] sm:$0xff]  ;;  %v307_v16 = vld [vmem:[%s2077_s6 + $0x48] sm:$0xff] }
  0x53   : > { %1650 = vmatpush3.bf16.msra.mxu0 %v348_v4  ;;  %1651 = vmatprep.mubr.msk.bf16.mxu0 %vm349_vm1, %v330_v8  ;;  %v333_v17 = vpack.c.bf16 %v305_v14, %v304_v13  ;;  %v334_v18 = vpack.c.bf16 %v307_v16, %v306_v15  ;;  %v308_v19 = vld [vmem:[%s2077_s6 + $0x50] sm:$0xff]  ;;  %v309_v20 = vld [vmem:[%s2077_s6 + $0x58] sm:$0xff]  ;;  %v310_v21 = vld [vmem:[%s2077_s6 + $0x60] sm:$0xff] }
  0x54   : > { %v311_v22 = vld [vmem:[%s2077_s6 + $0x68] sm:$0xff]  ;;  %v335_v23 = vpack.c.bf16 %v309_v20, %v308_v19  ;;  %v312_v25 = vld [vmem:[%s2077_s6 + $0x70] sm:$0xff]  ;;  %v313_v26 = vld [vmem:[%s2077_s6 + $0x78] sm:$0xff] }
  0x55   : > { %v336_v24 = vpack.c.bf16 %v311_v22, %v310_v21  ;;  %v314_v27 = vld [vmem:[%s2077_s6 + $0x80] sm:$0xff]  ;;  %v315_v28 = vld [vmem:[%s2077_s6 + $0x88] sm:$0xff]  ;;  %v337_v29 = vpack.c.bf16 %v313_v26, %v312_v25  ;;  %v316_v31 = vld [vmem:[%s2077_s6 + $0x90] sm:$0xff] }
  0x56   : > { %1652 = vmatmul.mubr.msk.bf16.vlgmr.msra.gmra.mrb[0].mxu0 %vm349_vm1, %v331_v11  ;;  %v338_v30 = vpack.c.bf16 %v315_v28, %v314_v27  ;;  %v317_v32 = vld [vmem:[%s2077_s6 + $0x98] sm:$0xff]  ;;  %v318_v33 = vld [vmem:[%s2077_s6 + $0xa0] sm:$0xff]  ;;  %v319_v34 = vld [vmem:[%s2077_s6 + $0xa8] sm:$0xff] }
  0x57   : > { %1655 = vmatprep.mubr.msk.bf16.mxu0 %vm349_vm1, %v332_v12  ;;  %v339_v35 = vpack.c.bf16 %v317_v32, %v316_v31  ;;  %v340_v36 = vpack.c.bf16 %v319_v34, %v318_v33  ;;  %v320_v37 = vld [vmem:[%s2077_s6 + $0xb0] sm:$0xff]  ;;  %v321_v38 = vld [vmem:[%s2077_s6 + $0xb8] sm:$0xff]  ;;  %v322_v39 = vld [vmem:[%s2077_s6 + $0xc0] sm:$0xff] }
  0x58   : > { %v323_v40 = vld [vmem:[%s2077_s6 + $0xc8] sm:$0xff]  ;;  %v341_v41 = vpack.c.bf16 %v321_v38, %v320_v37  ;;  %v324_v43 = vld [vmem:[%s2077_s6 + $0xd0] sm:$0xff]  ;;  %v325_v44 = vld [vmem:[%s2077_s6 + $0xd8] sm:$0xff] }
  0x59   : > { %v342_v42 = vpack.c.bf16 %v323_v40, %v322_v39  ;;  %v326_v45 = vld [vmem:[%s2077_s6 + $0xe0] sm:$0xff]  ;;  %v327_v46 = vld [vmem:[%s2077_s6 + $0xe8] sm:$0xff]  ;;  %v343_v47 = vpack.c.bf16 %v325_v44, %v324_v43  ;;  %v328_v49 = vld [vmem:[%s2077_s6 + $0xf0] sm:$0xff] }
  0x5a   : > { %v344_v48 = vpack.c.bf16 %v327_v46, %v326_v45  ;;  %v329_v50 = vld [vmem:[%s2077_s6 + $0xf8] sm:$0xff]  ;;  %v1794_v53 = vld [vmem:[%s2066_s8 + $0x4] ss:$8 sps:$4 sm:$0xff]   ;;  %v1792_v39 = vld [vmem:[%s2066_s8] ss:$8 sps:$4 sm:$0xff]  }
  0x5b   : > { %v345_v51 = vpack.c.bf16 %v329_v50, %v328_v49  ;;  %v1776_v52 = vld [vmem:[%s2066_s8 + $0x54] ss:$8 sps:$4 sm:$0xff]   ;;  %v1774_v38 = vld [vmem:[%s2066_s8 + $0x50] ss:$8 sps:$4 sm:$0xff]   ;;  %v1777_v40 = vld [vmem:[%s2066_s8 + $0x64] ss:$8 sps:$4 sm:$0xff]  }
  0x5c   : > { %871 = vmatprep.mubr.bf16.mxu1 %v1776_v52  ;;  %v1800_v43 = vld [vmem:[%s2066_s8 + $0x10] ss:$8 sps:$4 sm:$0xff]   ;;  %v1780_v44 = vld [vmem:[%s2066_s8 + $0x74] ss:$8 sps:$4 sm:$0xff]   ;;  %v1804_v45 = vld [vmem:[%s2066_s8 + $0x24] ss:$8 sps:$4 sm:$0xff]  }
  0x5d   : > { %v1782_v46 = vld [vmem:[%s2066_s8 + $0x70] ss:$8 sps:$4 sm:$0xff]   ;;  %v1810_v49 = vld [vmem:[%s2066_s8 + $0x34] ss:$8 sps:$4 sm:$0xff]   ;;  %v1785_v50 = vld [vmem:[%s2066_s8 + $0x80] ss:$8 sps:$4 sm:$0xff]  }
  0x5e   : > { %1656 = vmatmul.mubr.msk.bf16.gmra.mrb[4].mxu0 %vm349_vm1, %v333_v17  ;;  %v1786_v52 = vld [vmem:[%s2066_s8 + $0x94] ss:$8 sps:$4 sm:$0xff]  }
  0x5f   : > { %1659 = vmatprep.mubr.msk.bf16.mxu0 %vm349_vm1, %v334_v18 }
  0x66   : > { %1660 = vmatmul.mubr.msk.bf16.gmra.mrb[8].mxu0 %vm349_vm1, %v335_v23 }
  0x67   : > { %1663 = vmatprep.mubr.msk.bf16.mxu0 %vm349_vm1, %v336_v24 }
  0x6e   : > { %1664 = vmatmul.mubr.msk.bf16.gmra.mrb[12].mxu0 %vm349_vm1, %v337_v29 }
  0x6f   : > { %1667 = vmatprep.mubr.msk.bf16.mxu0 %vm349_vm1, %v338_v30 }
  0x76   : > { %1668 = vmatmul.mubr.msk.bf16.gmra.mrb[16].mxu0 %vm349_vm1, %v339_v35 }
  0x77   : > { %1671 = vmatprep.mubr.msk.bf16.mxu0 %vm349_vm1, %v340_v36 }
  0x7e   : > { %1672 = vmatmul.mubr.msk.bf16.gmra.mrb[20].mxu0 %vm349_vm1, %v341_v41  ;;  %v1798_v41 = vld [vmem:[%s2066_s8 + $0x14] ss:$8 sps:$4 sm:$0xff]  }
  0x7f   : > { %1675 = vmatprep.mubr.msk.bf16.mxu0 %vm349_vm1, %v342_v42  ;;  %v1779_v42 = vld [vmem:[%s2066_s8 + $0x60] ss:$8 sps:$4 sm:$0xff]  }
  0x86   : > { %1676 = vmatmul.mubr.msk.bf16.gmra.mrb[24].mxu0 %vm349_vm1, %v343_v47  ;;  %v1806_v47 = vld [vmem:[%s2066_s8 + $0x20] ss:$8 sps:$4 sm:$0xff]  }
  0x87   : > { %1679 = vmatprep.mubr.msk.bf16.mxu0 %vm349_vm1, %v344_v48  ;;  %v1783_v48 = vld [vmem:[%s2066_s8 + $0x84] ss:$8 sps:$4 sm:$0xff]  }
  0x8e   : > { %1680 = vmatmul.mubr.msk.bf16.gmra.mrb[28].mxu0 %vm349_vm1, %v345_v51  ;;  %v1812_v51 = vld [vmem:[%s2066_s8 + $0x30] ss:$8 sps:$4 sm:$0xff]  }
  0x8f   : > { %831 = vmatprep.mubr.bf16.mxu0 %v1794_v53  ;;  %v1816_v53 = vld [vmem:[%s2066_s8 + $0x44] ss:$8 sps:$4 sm:$0xff]  }
 0x129   : > { %v1653_v54 = vpop.f32.mrb[0].mxu0 }
 0x12a   : > { %v432_v55 = vpop.f32.mrb[1].mxu0 }
 0x12b   : > { %v1654_v56 = vpop.f32.mrb[2].mxu0 }
 0x12c   : > { %v624_v57 = vpack.c.bf16 %v1654_v56, %v1653_v54  ;;  %v435_v58 = vpop.f32.mrb[3].mxu0  ;;  %v1788_v54 = vld [vmem:[%s2066_s8 + $0x90] ss:$8 sps:$4 sm:$0xff]   ;;  %v1789_v56 = vld [vmem:[%s2066_s8 + $0xa4] ss:$8 sps:$4 sm:$0xff]  }
 0x12d   : > { %v623_v59 = vpack.c.bf16 %v435_v58, %v432_v55  ;;  %v1818_v55 = vld [vmem:[%s2066_s8 + $0x40] ss:$8 sps:$4 sm:$0xff]   ;;  %v1795_v58 = vld [vmem:[%s2066_s8 + $0xb4] ss:$8 sps:$4 sm:$0xff]  }
 0x131   : > { %v1657_v60 = vpop.f32.mrb[4].mxu0 }
 0x132   : > { %v448_v61 = vpop.f32.mrb[5].mxu0 }
 0x133   : > { %v1658_v62 = vpop.f32.mrb[6].mxu0 }
 0x134   : > { %v626_v63 = vpack.c.bf16 %v1658_v62, %v1657_v60  ;;  %v451_v0 = vpop.f32.mrb[7].mxu0  ;;  %v1801_v60 = vld [vmem:[%s2066_s8 + $0xc4] ss:$8 sps:$4 sm:$0xff]   ;;  %v1807_v62 = vld [vmem:[%s2066_s8 + $0xd4] ss:$8 sps:$4 sm:$0xff]  }
 0x135   : > { %v625_v1 = vpack.c.bf16 %v451_v0, %v448_v61  ;;  %v1803_v61 = vld [vmem:[%s2066_s8 + $0xc0] ss:$8 sps:$4 sm:$0xff]   ;;  %v1813_v0 = vld [vmem:[%s2066_s8 + $0xe4] ss:$8 sps:$4 sm:$0xff]  }
 0x139   : > { %v1661_v2 = vpop.f32.mrb[8].mxu0 }
 0x13a   : > { %v464_v3 = vpop.f32.mrb[9].mxu0 }
 0x13b   : > { %v1662_v4 = vpop.f32.mrb[10].mxu0 }
 0x13c   : > { %v628_v5 = vpack.c.bf16 %v1662_v4, %v1661_v2  ;;  %v467_v6 = vpop.f32.mrb[11].mxu0  ;;  %v1819_v2 = vld [vmem:[%s2066_s8 + $0xf4] ss:$8 sps:$4 sm:$0xff]  }
 0x13d   : > { %v627_v7 = vpack.c.bf16 %v467_v6, %v464_v3  ;;  %v1821_v3 = vld [vmem:[%s2066_s8 + $0xf0] ss:$8 sps:$4 sm:$0xff]  }
 0x13e   : > { %v569_v6 = vld [vmem:[#allocation2 + $0x50] sm:$0xff] }
 0x141   : > { %v1665_v8 = vpop.f32.mrb[12].mxu0 }
 0x142   : > { %v480_v9 = vpop.f32.mrb[13].mxu0 }
 0x143   : > { %v1666_v10 = vpop.f32.mrb[14].mxu0 }
 0x144   : > { %v630_v11 = vpack.c.bf16 %v1666_v10, %v1665_v8  ;;  %v483_v12 = vpop.f32.mrb[15].mxu0  ;;  %v559_v8 = vld [vmem:[#allocation2] sm:$0xff] }
 0x145   : > { %v629_v13 = vpack.c.bf16 %v483_v12, %v480_v9 }
 0x149   : > { %v1669_v14 = vpop.f32.mrb[16].mxu0 }
 0x14a   : > { %v496_v15 = vpop.f32.mrb[17].mxu0 }
 0x14b   : > { %v1670_v16 = vpop.f32.mrb[18].mxu0 }
 0x14c   : > { %v632_v17 = vpack.c.bf16 %v1670_v16, %v1669_v14  ;;  %v499_v18 = vpop.f32.mrb[19].mxu0  ;;  %v570_v14 = vld [vmem:[#allocation2 + $0x58] sm:$0xff]  ;;  %v560_v16 = vld [vmem:[#allocation2 + $0x8] sm:$0xff] }
 0x14d   : > { %v631_v19 = vpack.c.bf16 %v499_v18, %v496_v15 }
 0x14f   : > { %1537 = vmatprep.subr.bf16.mxu0 %v631_v19  ;;  %1683 = vmatprep.subr.bf16.mxu1 %v631_v19 }
 0x150   : > { %1538 = vmatpush3.bf16.msra.mxu0 %v623_v59  ;;  %1691 = vmatpush3.bf16.msra.mxu1 %v623_v59  ;;  %v1797_v59 = vld [vmem:[%s2066_s8 + $0xb0] ss:$8 sps:$4 sm:$0xff]  }
 0x151   : > { %v1673_v20 = vpop.f32.mrb[20].mxu0  ;;  %1539 = vmatprep.subr.bf16.mxu0 %v632_v17  ;;  %1684 = vmatprep.subr.bf16.mxu1 %v632_v17 }
 0x152   : > { %v512_v21 = vpop.f32.mrb[21].mxu0 }
 0x153   : > { %v1674_v22 = vpop.f32.mrb[22].mxu0 }
 0x154   : > { %v634_v23 = vpack.c.bf16 %v1674_v22, %v1673_v20  ;;  %v515_v24 = vpop.f32.mrb[23].mxu0  ;;  %1540 = vmatpush3.bf16.msra.mxu0 %v624_v57  ;;  %1692 = vmatpush3.bf16.msra.mxu1 %v624_v57  ;;  %v1791_v57 = vld [vmem:[%s2066_s8 + $0xa0] ss:$8 sps:$4 sm:$0xff]  }
 0x155   : > { %v633_v25 = vpack.c.bf16 %v515_v24, %v512_v21 }
 0x157   : > { %1541 = vmatprep.subr.bf16.mxu0 %v633_v25  ;;  %1685 = vmatprep.subr.bf16.mxu1 %v633_v25 }
 0x158   : > { %1542 = vmatpush3.bf16.msra.mxu0 %v625_v1  ;;  %1693 = vmatpush3.bf16.msra.mxu1 %v625_v1  ;;  %v1815_v1 = vld [vmem:[%s2066_s8 + $0xe0] ss:$8 sps:$4 sm:$0xff]  }
 0x159   : > { %v1677_v26 = vpop.f32.mrb[24].mxu0  ;;  %1543 = vmatprep.subr.bf16.mxu0 %v634_v23  ;;  %1686 = vmatprep.subr.bf16.mxu1 %v634_v23 }
 0x15a   : > { %v528_v27 = vpop.f32.mrb[25].mxu0 }
 0x15b   : > { %v1678_v28 = vpop.f32.mrb[26].mxu0 }
 0x15c   : > { %v636_v29 = vpack.c.bf16 %v1678_v28, %v1677_v26  ;;  %v531_v30 = vpop.f32.mrb[27].mxu0  ;;  %1544 = vmatpush3.bf16.msra.mxu0 %v626_v63  ;;  %1694 = vmatpush3.bf16.msra.mxu1 %v626_v63  ;;  %v1809_v63 = vld [vmem:[%s2066_s8 + $0xd0] ss:$8 sps:$4 sm:$0xff]   ;;  %v571_v26 = vld [vmem:[#allocation2 + $0x60] sm:$0xff] }
 0x15d   : > { %v635_v31 = vpack.c.bf16 %v531_v30, %v528_v27  ;;  %v561_v28 = vld [vmem:[#allocation2 + $0x10] sm:$0xff] }
 0x15f   : > { %1545 = vmatprep.subr.bf16.mxu0 %v635_v31  ;;  %1687 = vmatprep.subr.bf16.mxu1 %v635_v31 }
 0x160   : > { %1546 = vmatpush3.bf16.msra.mxu0 %v627_v7  ;;  %1695 = vmatpush3.bf16.msra.mxu1 %v627_v7 }
 0x161   : > { %v1681_v32 = vpop.f32.mrb[28].mxu0  ;;  %1547 = vmatprep.subr.bf16.mxu0 %v636_v29  ;;  %1688 = vmatprep.subr.bf16.mxu1 %v636_v29 }
 0x162   : > { %v544_v33 = vpop.f32.mrb[29].mxu0 }
 0x163   : > { %v1682_v34 = vpop.f32.mrb[30].mxu0 }
 0x164   : > { %v638_v35 = vpack.c.bf16 %v1682_v34, %v1681_v32  ;;  %v547_v36 = vpop.f32.mrb[31].mxu0  ;;  %1548 = vmatpush3.bf16.msra.mxu0 %v628_v5  ;;  %1696 = vmatpush3.bf16.msra.mxu1 %v628_v5  ;;  %v572_v34 = vld [vmem:[#allocation2 + $0x68] sm:$0xff] }
 0x165   : > { %v637_v37 = vpack.c.bf16 %v547_v36, %v544_v33  ;;  %v562_v36 = vld [vmem:[#allocation2 + $0x18] sm:$0xff] }
 0x167   : > { %1549 = vmatprep.subr.bf16.mxu0 %v637_v37  ;;  %1689 = vmatprep.subr.bf16.mxu1 %v637_v37 }
 0x168   : > { %1550 = vmatpush3.bf16.msra.mxu0 %v629_v13  ;;  %1697 = vmatpush3.bf16.msra.mxu1 %v629_v13 }
 0x169   : > { %1551 = vmatprep.subr.bf16.mxu0 %v638_v35  ;;  %1690 = vmatprep.subr.bf16.mxu1 %v638_v35 }
 0x16c   : > { %1552 = vmatpush3.bf16.msra.mxu0 %v630_v11  ;;  %1698 = vmatpush3.bf16.msra.mxu1 %v630_v11 }
 0x16f   : > { %872 = vmatmul.mubr.bf16.vlgmr.msra.gmra.mrb[0].mxu1 %v1774_v38  ;;  %832 = vmatmul.mubr.bf16.vlgmr.msra.gmra.mrb[32].mxu0 %v1792_v39 }
 0x170   : > { %879 = vmatprep.mubr.bf16.mxu1 %v1777_v40  ;;  %839 = vmatprep.mubr.bf16.mxu0 %v1798_v41 }
 0x177   : > { %880 = vmatmul.mubr.bf16.gmra.mrb[4].mxu1 %v1779_v42  ;;  %840 = vmatmul.mubr.bf16.gmra.mrb[36].mxu0 %v1800_v43 }
 0x178   : > { %887 = vmatprep.mubr.bf16.mxu1 %v1780_v44  ;;  %847 = vmatprep.mubr.bf16.mxu0 %v1804_v45 }
 0x17f   : > { %888 = vmatmul.mubr.bf16.gmra.mrb[8].mxu1 %v1782_v46  ;;  %848 = vmatmul.mubr.bf16.gmra.mrb[40].mxu0 %v1806_v47  ;;  %v573_v46 = vld [vmem:[#allocation2 + $0x70] sm:$0xff] }
 0x180   : > { %895 = vmatprep.mubr.bf16.mxu1 %v1783_v48  ;;  %855 = vmatprep.mubr.bf16.mxu0 %v1810_v49  ;;  %v563_v48 = vld [vmem:[#allocation2 + $0x20] sm:$0xff] }
 0x187   : > { %896 = vmatmul.mubr.bf16.gmra.mrb[12].mxu1 %v1785_v50  ;;  %856 = vmatmul.mubr.bf16.gmra.mrb[44].mxu0 %v1812_v51 }
 0x188   : > { %903 = vmatprep.mubr.bf16.mxu1 %v1786_v52  ;;  %863 = vmatprep.mubr.bf16.mxu0 %v1816_v53 }
 0x18f   : > { %904 = vmatmul.mubr.bf16.gmra.mrb[16].mxu1 %v1788_v54  ;;  %864 = vmatmul.mubr.bf16.gmra.mrb[48].mxu0 %v1818_v55  ;;  %v574_v54 = vld [vmem:[#allocation2 + $0x78] sm:$0xff] }
 0x190   : > { %911 = vmatprep.mubr.bf16.mxu1 %v1789_v56  ;;  %v564_v56 = vld [vmem:[#allocation2 + $0x28] sm:$0xff] }
 0x197   : > { %912 = vmatmul.mubr.bf16.gmra.mrb[20].mxu1 %v1791_v57 }
 0x198   : > { %919 = vmatprep.mubr.bf16.mxu1 %v1795_v58 }
 0x19f   : > { %920 = vmatmul.mubr.bf16.gmra.mrb[24].mxu1 %v1797_v59 }
 0x1a0   : > { %927 = vmatprep.mubr.bf16.mxu1 %v1801_v60 }
 0x1a7   : > { %928 = vmatmul.mubr.bf16.gmra.mrb[28].mxu1 %v1803_v61 }
 0x1a8   : > { %935 = vmatprep.mubr.bf16.mxu1 %v1807_v62 }
 0x1af   : > { %936 = vmatmul.mubr.bf16.gmra.mrb[32].mxu1 %v1809_v63 }
 0x1b0   : > { %943 = vmatprep.mubr.bf16.mxu1 %v1813_v0 }
 0x1b7   : > { %944 = vmatmul.mubr.bf16.gmra.mrb[36].mxu1 %v1815_v1 }
 0x1b8   : > { %951 = vmatprep.mubr.bf16.mxu1 %v1819_v2  ;;  %v575_v2 = vld [vmem:[#allocation2 + $0x80] sm:$0xff] }
 0x1bf   : > { %952 = vmatmul.mubr.bf16.gmra.mrb[40].mxu1 %v1821_v3 }
 0x242   : > { %v1583_v4 = vpop.f32.mrb[0].mxu1  ;;  %v1553_v5 = vpop.f32.mrb[32].mxu0 }
 0x243   : > { %v1584_v7 = vpop.f32.mrb[1].mxu1  ;;  %v1554_v9 = vpop.f32.mrb[33].mxu0 }
 0x244   : > { %v1585_v10 = vadd.f32 %v1584_v7, %v1583_v4  ;;  %v1586_v11 = vpop.f32.mrb[2].mxu1  ;;  %v1555_v12 = vadd.f32 %v1554_v9, %v1553_v5  ;;  %v1556_v13 = vpop.f32.mrb[34].mxu0  ;;  %v565_v4 = vld [vmem:[#allocation2 + $0x30] sm:$0xff] }
 0x245   : > { %v1587_v15 = vpop.f32.mrb[3].mxu1  ;;  %v1557_v17 = vpop.f32.mrb[35].mxu0 }
 0x246   : > { %v970_v18 = vadd.f32 %v1585_v10, %v569_v6  ;;  %v1588_v19 = vadd.f32 %v1587_v15, %v1586_v11  ;;  %v960_v20 = vadd.f32 %v1555_v12, %v559_v8  ;;  %v1558_v21 = vadd.f32 %v1557_v17, %v1556_v13  ;;  %v576_v10 = vld [vmem:[#allocation2 + $0x88] sm:$0xff]  ;;  %v566_v12 = vld [vmem:[#allocation2 + $0x38] sm:$0xff] }
 0x248   : > { %1003 = vst.msk [vmem:[#allocation2 + $0x50] sm:$0xff] %vm992_vm2, %v970_v18  ;;  %v971_v22 = vadd.f32 %v1588_v19, %v570_v14  ;;  %993 = vst.msk [vmem:[#allocation2] sm:$0xff] %vm992_vm2, %v960_v20  ;;  %v961_v23 = vadd.f32 %v1558_v21, %v560_v16 }
 0x24a   : > { %1004 = vst.msk [vmem:[#allocation2 + $0x58] sm:$0xff] %vm992_vm2, %v971_v22  ;;  %v1589_v24 = vpop.f32.mrb[4].mxu1  ;;  %994 = vst.msk [vmem:[#allocation2 + $0x8] sm:$0xff] %vm992_vm2, %v961_v23  ;;  %v1559_v25 = vpop.f32.mrb[36].mxu0  ;;  %v577_v22 = vld [vmem:[#allocation2 + $0x90] sm:$0xff] }
 0x24b   : > { %v1590_v27 = vpop.f32.mrb[5].mxu1  ;;  %v1560_v29 = vpop.f32.mrb[37].mxu0 }
 0x24c   : > { %v1591_v30 = vadd.f32 %v1590_v27, %v1589_v24  ;;  %v1592_v31 = vpop.f32.mrb[6].mxu1  ;;  %v1561_v32 = vadd.f32 %v1560_v29, %v1559_v25  ;;  %v1562_v33 = vpop.f32.mrb[38].mxu0  ;;  %v567_v24 = vld [vmem:[#allocation2 + $0x40] sm:$0xff] }
 0x24d   : > { %v1593_v35 = vpop.f32.mrb[7].mxu1  ;;  %v1563_v37 = vpop.f32.mrb[39].mxu0 }
 0x24e   : > { %v972_v38 = vadd.f32 %v1591_v30, %v571_v26  ;;  %v1594_v39 = vadd.f32 %v1593_v35, %v1592_v31  ;;  %v962_v40 = vadd.f32 %v1561_v32, %v561_v28  ;;  %v1564_v41 = vadd.f32 %v1563_v37, %v1562_v33  ;;  %v578_v30 = vld [vmem:[#allocation2 + $0x98] sm:$0xff]  ;;  %v568_v32 = vld [vmem:[#allocation2 + $0x48] sm:$0xff] }
 0x250   : > { %1005 = vst.msk [vmem:[#allocation2 + $0x60] sm:$0xff] %vm992_vm2, %v972_v38  ;;  %v973_v42 = vadd.f32 %v1594_v39, %v572_v34  ;;  %995 = vst.msk [vmem:[#allocation2 + $0x10] sm:$0xff] %vm992_vm2, %v962_v40  ;;  %v963_v43 = vadd.f32 %v1564_v41, %v562_v36  ;;  %v579_v41 = vld [vmem:[#allocation2 + $0xa0] sm:$0xff] }
 0x252   : > { %1006 = vst.msk [vmem:[#allocation2 + $0x68] sm:$0xff] %vm992_vm2, %v973_v42  ;;  %v1595_v44 = vpop.f32.mrb[8].mxu1  ;;  %996 = vst.msk [vmem:[#allocation2 + $0x18] sm:$0xff] %vm992_vm2, %v963_v43  ;;  %v1565_v45 = vpop.f32.mrb[40].mxu0 }
 0x253   : > { %v1596_v47 = vpop.f32.mrb[9].mxu1  ;;  %v1566_v49 = vpop.f32.mrb[41].mxu0 }
 0x254   : > { %v1597_v50 = vadd.f32 %v1596_v47, %v1595_v44  ;;  %v1598_v51 = vpop.f32.mrb[10].mxu1  ;;  %v1567_v52 = vadd.f32 %v1566_v49, %v1565_v45  ;;  %v1568_v53 = vpop.f32.mrb[42].mxu0  ;;  %v580_v45 = vld [vmem:[#allocation2 + $0xa8] sm:$0xff] }
 0x255   : > { %v1599_v55 = vpop.f32.mrb[11].mxu1  ;;  %v1569_v57 = vpop.f32.mrb[43].mxu0 }
 0x256   : > { %v974_v58 = vadd.f32 %v1597_v50, %v573_v46  ;;  %v1600_v59 = vadd.f32 %v1599_v55, %v1598_v51  ;;  %v964_v60 = vadd.f32 %v1567_v52, %v563_v48  ;;  %v1570_v61 = vadd.f32 %v1569_v57, %v1568_v53  ;;  %v581_v51 = vld [vmem:[#allocation2 + $0xb0] sm:$0xff]  ;;  %v582_v55 = vld [vmem:[#allocation2 + $0xb8] sm:$0xff] }
 0x258   : > { %1007 = vst.msk [vmem:[#allocation2 + $0x70] sm:$0xff] %vm992_vm2, %v974_v58  ;;  %v975_v62 = vadd.f32 %v1600_v59, %v574_v54  ;;  %997 = vst.msk [vmem:[#allocation2 + $0x20] sm:$0xff] %vm992_vm2, %v964_v60  ;;  %v965_v63 = vadd.f32 %v1570_v61, %v564_v56  ;;  %v583_v61 = vld [vmem:[#allocation2 + $0xc0] sm:$0xff] }
 0x25a   : > { %1008 = vst.msk [vmem:[#allocation2 + $0x78] sm:$0xff] %vm992_vm2, %v975_v62  ;;  %v1601_v0 = vpop.f32.mrb[12].mxu1  ;;  %998 = vst.msk [vmem:[#allocation2 + $0x28] sm:$0xff] %vm992_vm2, %v965_v63  ;;  %v1571_v1 = vpop.f32.mrb[44].mxu0 }
 0x25b   : > { %v1602_v3 = vpop.f32.mrb[13].mxu1  ;;  %v1572_v5 = vpop.f32.mrb[45].mxu0 }
 0x25c   : > { %v1603_v6 = vadd.f32 %v1602_v3, %v1601_v0  ;;  %v1604_v7 = vpop.f32.mrb[14].mxu1  ;;  %v1573_v8 = vadd.f32 %v1572_v5, %v1571_v1  ;;  %v1574_v9 = vpop.f32.mrb[46].mxu0  ;;  %v584_v1 = vld [vmem:[#allocation2 + $0xc8] sm:$0xff] }
 0x25d   : > { %v1605_v11 = vpop.f32.mrb[15].mxu1  ;;  %v1575_v13 = vpop.f32.mrb[47].mxu0 }
 0x25e   : > { %v976_v14 = vadd.f32 %v1603_v6, %v575_v2  ;;  %v1606_v15 = vadd.f32 %v1605_v11, %v1604_v7  ;;  %v966_v16 = vadd.f32 %v1573_v8, %v565_v4  ;;  %v1576_v17 = vadd.f32 %v1575_v13, %v1574_v9  ;;  %v585_v7 = vld [vmem:[#allocation2 + $0xd0] sm:$0xff]  ;;  %v586_v11 = vld [vmem:[#allocation2 + $0xd8] sm:$0xff] }
 0x260   : > { %1009 = vst.msk [vmem:[#allocation2 + $0x80] sm:$0xff] %vm992_vm2, %v976_v14  ;;  %v977_v18 = vadd.f32 %v1606_v15, %v576_v10  ;;  %999 = vst.msk [vmem:[#allocation2 + $0x30] sm:$0xff] %vm992_vm2, %v966_v16  ;;  %v967_v19 = vadd.f32 %v1576_v17, %v566_v12  ;;  %v587_v17 = vld [vmem:[#allocation2 + $0xe0] sm:$0xff] }
 0x262   : > { %1010 = vst.msk [vmem:[#allocation2 + $0x88] sm:$0xff] %vm992_vm2, %v977_v18  ;;  %v1607_v20 = vpop.f32.mrb[16].mxu1  ;;  %1000 = vst.msk [vmem:[#allocation2 + $0x38] sm:$0xff] %vm992_vm2, %v967_v19  ;;  %v1577_v21 = vpop.f32.mrb[48].mxu0 }
 0x263   : > { %v1608_v23 = vpop.f32.mrb[17].mxu1  ;;  %v1578_v25 = vpop.f32.mrb[49].mxu0 }
 0x264   : > { %v1609_v26 = vadd.f32 %v1608_v23, %v1607_v20  ;;  %v1610_v27 = vpop.f32.mrb[18].mxu1  ;;  %v1579_v28 = vadd.f32 %v1578_v25, %v1577_v21  ;;  %v1580_v29 = vpop.f32.mrb[50].mxu0  ;;  %v588_v21 = vld [vmem:[#allocation2 + $0xe8] sm:$0xff] }
 0x265   : > { %v1611_v31 = vpop.f32.mrb[19].mxu1  ;;  %v1581_v33 = vpop.f32.mrb[51].mxu0 }
 0x266   : > { %v978_v34 = vadd.f32 %v1609_v26, %v577_v22  ;;  %v1612_v35 = vadd.f32 %v1611_v31, %v1610_v27  ;;  %v968_v36 = vadd.f32 %v1579_v28, %v567_v24  ;;  %v1582_v37 = vadd.f32 %v1581_v33, %v1580_v29  ;;  %v589_v27 = vld [vmem:[#allocation2 + $0xf0] sm:$0xff]  ;;  %v590_v31 = vld [vmem:[#allocation2 + $0xf8] sm:$0xff] }
 0x268   : > { %1011 = vst.msk [vmem:[#allocation2 + $0x90] sm:$0xff] %vm992_vm2, %v978_v34  ;;  %v979_v38 = vadd.f32 %v1612_v35, %v578_v30  ;;  %1001 = vst.msk [vmem:[#allocation2 + $0x40] sm:$0xff] %vm992_vm2, %v968_v36  ;;  %v969_v39 = vadd.f32 %v1582_v37, %v568_v32  ;;  %v1029_v36 = vld [vmem:[#allocation2] sm:$0xff] (!%p1451_p6) }
 0x269   : > { %v2239_v37 = vld [vmem:[%s2364_s3] ss:$0 sm:$0xff] (!%p1451_p6) }
 0x26a   : > { %1012 = vst.msk [vmem:[#allocation2 + $0x98] sm:$0xff] %vm992_vm2, %v979_v38  ;;  %v1613_v40 = vpop.f32.mrb[20].mxu1  ;;  %1002 = vst.msk [vmem:[#allocation2 + $0x48] sm:$0xff] %vm992_vm2, %v969_v39  ;;  %v1030_v38 = vld [vmem:[#allocation2 + $0x8] sm:$0xff] (!%p1451_p6)  ;;  %v1068_v39 = vadd.f32 (!%p1451_p6), %v2239_v37, %v1029_v36 }
 0x26b   : > { %v1614_v42 = vpop.f32.mrb[21].mxu1 }
 0x26c   : > { %v1615_v43 = vadd.f32 %v1614_v42, %v1613_v40  ;;  %v1616_v44 = vpop.f32.mrb[22].mxu1  ;;  %v1069_v40 = vadd.f32 (!%p1451_p6), %v2239_v37, %v1030_v38  ;;  %v1032_v42 = vld [vmem:[#allocation2 + $0x18] sm:$0xff] (!%p1451_p6) }
 0x26d   : > { %v1617_v46 = vpop.f32.mrb[23].mxu1 }
 0x26e   : > { %v980_v47 = vadd.f32 %v1615_v43, %v579_v41  ;;  %v1618_v48 = vadd.f32 %v1617_v46, %v1616_v44  ;;  %v1031_v41 = vld [vmem:[#allocation2 + $0x10] sm:$0xff] (!%p1451_p6)  ;;  %v1033_v43 = vld [vmem:[#allocation2 + $0x20] sm:$0xff] (!%p1451_p6) }
 0x26f   : > { %v1070_v44 = vadd.f32 (!%p1451_p6), %v2239_v37, %v1031_v41  ;;  %v1072_v46 = vadd.f32 (!%p1451_p6), %v2239_v37, %v1033_v43 }
 0x270   : > { %1013 = vst.msk [vmem:[#allocation2 + $0xa0] sm:$0xff] %vm992_vm2, %v980_v47  ;;  %v981_v49 = vadd.f32 %v1618_v48, %v580_v45  ;;  %v1071_v45 = vadd.f32 (!%p1451_p6), %v2239_v37, %v1032_v42  ;;  %v1034_v47 = vld [vmem:[#allocation2 + $0x28] sm:$0xff] (!%p1451_p6)  ;;  %v1035_v48 = vld [vmem:[#allocation2 + $0x30] sm:$0xff] (!%p1451_p6) }
 0x272   : > { %1014 = vst.msk [vmem:[#allocation2 + $0xa8] sm:$0xff] %vm992_vm2, %v981_v49  ;;  %v1619_v50 = vpop.f32.mrb[24].mxu1  ;;  %v1036_v49 = vld [vmem:[#allocation2 + $0x38] sm:$0xff] (!%p1451_p6) }
 0x273   : > { %v1620_v52 = vpop.f32.mrb[25].mxu1 }
 0x274   : > { %v1621_v53 = vadd.f32 %v1620_v52, %v1619_v50  ;;  %v1622_v54 = vpop.f32.mrb[26].mxu1  ;;  %v1100_v50 = vmax.f32 (!%p1451_p6), %v1068_v39, 0.0  ;;  %v1073_v52 = vadd.f32 (!%p1451_p6), %v2239_v37, %v1034_v47 }
 0x275   : > { %v1623_v56 = vpop.f32.mrb[27].mxu1 }
 0x276   : > { %v982_v57 = vadd.f32 %v1621_v53, %v581_v51  ;;  %v1624_v58 = vadd.f32 %v1623_v56, %v1622_v54  ;;  %v1101_v51 = vmax.f32 (!%p1451_p6), %v1069_v40, 0.0  ;;  %v1074_v53 = vadd.f32 (!%p1451_p6), %v2239_v37, %v1035_v48 }
 0x277   : > { %v1102_v54 = vmax.f32 (!%p1451_p6), %v1070_v44, 0.0  ;;  %v1104_v56 = vmax.f32 (!%p1451_p6), %v1072_v46, 0.0 }
 0x278   : > { %1015 = vst.msk [vmem:[#allocation2 + $0xb0] sm:$0xff] %vm992_vm2, %v982_v57  ;;  %v983_v59 = vadd.f32 %v1624_v58, %v582_v55  ;;  %v1103_v55 = vmax.f32 (!%p1451_p6), %v1071_v45, 0.0  ;;  %v1075_v57 = vadd.f32 (!%p1451_p6), %v2239_v37, %v1036_v49  ;;  %v1037_v58 = vld [vmem:[#allocation2 + $0x40] sm:$0xff] (!%p1451_p6) }
 0x279   : > { %v1050_v40 = vld [vmem:[#allocation2 + $0xa8] sm:$0xff] (!%p1451_p6) }
 0x27a   : > { %1016 = vst.msk [vmem:[#allocation2 + $0xb8] sm:$0xff] %vm992_vm2, %v983_v59  ;;  %v1625_v60 = vpop.f32.mrb[28].mxu1  ;;  %v1038_v59 = vld [vmem:[#allocation2 + $0x48] sm:$0xff] (!%p1451_p6) }
 0x27b   : > { %v1626_v62 = vpop.f32.mrb[29].mxu1 }
 0x27c   : > { %v1627_v63 = vadd.f32 %v1626_v62, %v1625_v60  ;;  %v1628_v0 = vpop.f32.mrb[30].mxu1  ;;  %v1488_v60 = vpack.c.bf16 (!%p1451_p6), %v1100_v50, %v1100_v50  ;;  %v1105_v62 = vmax.f32 (!%p1451_p6), %v1073_v52, 0.0 }
 0x27d   : > { %v1629_v2 = vpop.f32.mrb[31].mxu1 }
 0x27e   : > { %v984_v3 = vadd.f32 %v1627_v63, %v583_v61  ;;  %v1630_v4 = vadd.f32 %v1629_v2, %v1628_v0  ;;  %v1489_v61 = vpack.c.bf16 (!%p1451_p6), %v1101_v51, %v1101_v51  ;;  %v1106_v63 = vmax.f32 (!%p1451_p6), %v1074_v53, 0.0  ;;  %v1039_v0 = vld [vmem:[#allocation2 + $0x50] sm:$0xff] (!%p1451_p6)  ;;  %v1041_v2 = vld [vmem:[#allocation2 + $0x60] sm:$0xff] (!%p1451_p6)  ;;  %1261 = vst.msk [vmem:[%s2082_s29] sm:$0xf] (!%p1451_p6), %vm1260_vm3, %v1488_v60 }
 0x27f   : > { %v1051_v41 = vld [vmem:[#allocation2 + $0xb0] sm:$0xff] (!%p1451_p6)  ;;  %v1089_v53 = vadd.f32 (!%p1451_p6), %v2239_v37, %v1050_v40 }
 0x280   : > { %1017 = vst.msk [vmem:[#allocation2 + $0xc0] sm:$0xff] %vm992_vm2, %v984_v3  ;;  %v985_v5 = vadd.f32 %v1630_v4, %v584_v1  ;;  %v1040_v1 = vld [vmem:[#allocation2 + $0x58] sm:$0xff] (!%p1451_p6)  ;;  %v1490_v3 = vpack.c.bf16 (!%p1451_p6), %v1102_v54, %v1102_v54  ;;  %v1491_v4 = vpack.c.bf16 (!%p1451_p6), %v1103_v55, %v1103_v55  ;;  %v1090_v54 = vadd.f32 (!%p1451_p6), %v2239_v37, %v1051_v41 }
 0x281   : > { %1262 = vst.msk [vmem:[%s2082_s29 + $0x4] sm:$0xf] (!%p1451_p6), %vm1260_vm3, %v1489_v61  ;;  %v1052_v46 = vld [vmem:[#allocation2 + $0xb8] sm:$0xff] (!%p1451_p6) }
 0x282   : > { %1018 = vst.msk [vmem:[#allocation2 + $0xc8] sm:$0xff] %vm992_vm2, %v985_v5  ;;  %v1631_v6 = vpop.f32.mrb[32].mxu1  ;;  %v1492_v5 = vpack.c.bf16 (!%p1451_p6), %v1104_v56, %v1104_v56 }
 0x283   : > { %v1632_v8 = vpop.f32.mrb[33].mxu1  ;;  %1263 = vst.msk [vmem:[%s2082_s29 + $0x8] sm:$0xf] (!%p1451_p6), %vm1260_vm3, %v1490_v3  ;;  %1264 = vst.msk [vmem:[%s2082_s29 + $0xc] sm:$0xf] (!%p1451_p6), %vm1260_vm3, %v1491_v4 }
 0x284   : > { %v1633_v9 = vadd.f32 %v1632_v8, %v1631_v6  ;;  %v1634_v10 = vpop.f32.mrb[34].mxu1  ;;  %v1107_v6 = vmax.f32 (!%p1451_p6), %v1075_v57, 0.0  ;;  %v1043_v8 = vld [vmem:[#allocation2 + $0x70] sm:$0xff] (!%p1451_p6)  ;;  %1265 = vst.msk [vmem:[%s2082_s29 + $0x10] sm:$0xf] (!%p1451_p6), %vm1260_vm3, %v1492_v5 }
 0x285   : > { %v1635_v12 = vpop.f32.mrb[35].mxu1 }
 0x286   : > { %v986_v13 = vadd.f32 %v1633_v9, %v585_v7  ;;  %v1636_v14 = vadd.f32 %v1635_v12, %v1634_v10  ;;  %v1042_v7 = vld [vmem:[#allocation2 + $0x68] sm:$0xff] (!%p1451_p6)  ;;  %v1493_v9 = vpack.c.bf16 (!%p1451_p6), %v1105_v62, %v1105_v62  ;;  %v1494_v10 = vpack.c.bf16 (!%p1451_p6), %v1106_v63, %v1106_v63 }
 0x287   : > { %v1077_v12 = vadd.f32 (!%p1451_p6), %v2239_v37, %v1038_v59  ;;  %v1053_v59 = vld [vmem:[#allocation2 + $0xc0] sm:$0xff] (!%p1451_p6)  ;;  %v1121_v63 = vmax.f32 (!%p1451_p6), %v1089_v53, 0.0 }
 0x288   : > { %1019 = vst.msk [vmem:[#allocation2 + $0xd0] sm:$0xff] %vm992_vm2, %v986_v13  ;;  %v987_v15 = vadd.f32 %v1636_v14, %v586_v11  ;;  %v1076_v11 = vadd.f32 (!%p1451_p6), %v2239_v37, %v1037_v58  ;;  %v1044_v13 = vld [vmem:[#allocation2 + $0x78] sm:$0xff] (!%p1451_p6)  ;;  %v1495_v14 = vpack.c.bf16 (!%p1451_p6), %v1107_v6, %v1107_v6  ;;  %v1091_v58 = vadd.f32 (!%p1451_p6), %v2239_v37, %v1052_v46 }
 0x289   : > { %1266 = vst.msk [vmem:[%s2082_s29 + $0x14] sm:$0xf] (!%p1451_p6), %vm1260_vm3, %v1493_v9  ;;  %1267 = vst.msk [vmem:[%s2082_s29 + $0x18] sm:$0xf] (!%p1451_p6), %vm1260_vm3, %v1494_v10  ;;  %v1054_v60 = vld [vmem:[#allocation2 + $0xc8] sm:$0xff] (!%p1451_p6)  ;;  %v1509_v10 = vpack.c.bf16 (!%p1451_p6), %v1121_v63, %v1121_v63 }
 0x28a   : > { %1020 = vst.msk [vmem:[#allocation2 + $0xd8] sm:$0xff] %vm992_vm2, %v987_v15  ;;  %v1637_v16 = vpop.f32.mrb[36].mxu1  ;;  %v1078_v15 = vadd.f32 (!%p1451_p6), %v2239_v37, %v1039_v0  ;;  %v1122_v0 = vmax.f32 (!%p1451_p6), %v1090_v54, 0.0 }
 0x28b   : > { %v1638_v18 = vpop.f32.mrb[37].mxu1  ;;  %1268 = vst.msk [vmem:[%s2082_s29 + $0x1c] sm:$0xf] (!%p1451_p6), %vm1260_vm3, %v1495_v14  ;;  %1282 = vst.msk [vmem:[%s2082_s29 + $0x54] sm:$0xf] (!%p1451_p6), %vm1260_vm3, %v1509_v10 }
 0x28c   : > { %v1639_v19 = vadd.f32 %v1638_v18, %v1637_v16  ;;  %v1640_v20 = vpop.f32.mrb[38].mxu1  ;;  %v1079_v16 = vadd.f32 (!%p1451_p6), %v2239_v37, %v1040_v1  ;;  %v1108_v18 = vmax.f32 (!%p1451_p6), %v1076_v11, 0.0  ;;  %v1510_v11 = vpack.c.bf16 (!%p1451_p6), %v1122_v0, %v1122_v0 }
 0x28d   : > { %v1641_v22 = vpop.f32.mrb[39].mxu1 }
 0x28e   : > { %v988_v23 = vadd.f32 %v1639_v19, %v587_v17  ;;  %v1642_v24 = vadd.f32 %v1641_v22, %v1640_v20  ;;  %v1080_v17 = vadd.f32 (!%p1451_p6), %v2239_v37, %v1041_v2  ;;  %v1109_v19 = vmax.f32 (!%p1451_p6), %v1077_v12, 0.0  ;;  %1283 = vst.msk [vmem:[%s2082_s29 + $0x58] sm:$0xf] (!%p1451_p6), %vm1260_vm3, %v1510_v11 }
 0x28f   : > { %v1081_v20 = vadd.f32 (!%p1451_p6), %v2239_v37, %v1042_v7  ;;  %v1110_v22 = vmax.f32 (!%p1451_p6), %v1078_v15, 0.0  ;;  %v1055_v1 = vld [vmem:[#allocation2 + $0xd0] sm:$0xff] (!%p1451_p6)  ;;  %v1123_v7 = vmax.f32 (!%p1451_p6), %v1091_v58, 0.0  ;;  %v1092_v12 = vadd.f32 (!%p1451_p6), %v2239_v37, %v1053_v59 }
 0x290   : > { %1021 = vst.msk [vmem:[#allocation2 + $0xe0] sm:$0xff] %vm992_vm2, %v988_v23  ;;  %v989_v25 = vadd.f32 %v1642_v24, %v588_v21  ;;  %v1082_v21 = vadd.f32 (!%p1451_p6), %v2239_v37, %v1043_v8  ;;  %v1111_v23 = vmax.f32 (!%p1451_p6), %v1079_v16, 0.0  ;;  %v1112_v24 = vmax.f32 (!%p1451_p6), %v1080_v17, 0.0 }
 0x291   : > { %v1056_v2 = vld [vmem:[#allocation2 + $0xd8] sm:$0xff] (!%p1451_p6)  ;;  %v1511_v15 = vpack.c.bf16 (!%p1451_p6), %v1123_v7, %v1123_v7  ;;  %v1094_v16 = vadd.f32 (!%p1451_p6), %v2239_v37, %v1055_v1 }
 0x292   : > { %1022 = vst.msk [vmem:[#allocation2 + $0xe8] sm:$0xff] %vm992_vm2, %v989_v25  ;;  %v1643_v26 = vpop.f32.mrb[40].mxu1  ;;  %v1083_v25 = vadd.f32 (!%p1451_p6), %v2239_v37, %v1044_v13  ;;  %v1499_v36 = vpack.c.bf16 (!%p1451_p6), %v1111_v23, %v1111_v23  ;;  %v1500_v38 = vpack.c.bf16 (!%p1451_p6), %v1112_v24, %v1112_v24  ;;  %v1093_v13 = vadd.f32 (!%p1451_p6), %v2239_v37, %v1054_v60 }
 0x293   : > { %v1644_v28 = vpop.f32.mrb[41].mxu1  ;;  %v1095_v17 = vadd.f32 (!%p1451_p6), %v2239_v37, %v1056_v2  ;;  %1284 = vst.msk [vmem:[%s2082_s29 + $0x5c] sm:$0xf] (!%p1451_p6), %vm1260_vm3, %v1511_v15  ;;  %v1126_v23 = vmax.f32 (!%p1451_p6), %v1094_v16, 0.0 }
 0x294   : > { %v1645_v29 = vadd.f32 %v1644_v28, %v1643_v26  ;;  %v1646_v30 = vpop.f32.mrb[42].mxu1  ;;  %1028 = sbr.rel (%p1451_p6) target bundleno = 681 (0x2a9), region = 48  ;;  %v1045_v26 = vld [vmem:[#allocation2 + $0x80] sm:$0xff] (!%p1451_p6)  ;;  %v1496_v28 = vpack.c.bf16 (!%p1451_p6), %v1108_v18, %v1108_v18  ;;  %v1115_v39 = vmax.f32 (!%p1451_p6), %v1083_v25, 0.0  ;;  %1272 = vst.msk [vmem:[%s2082_s29 + $0x2c] sm:$0xf] (!%p1451_p6), %vm1260_vm3, %v1499_v36 }
 0x295   : > { %v1647_v32 = vpop.f32.mrb[43].mxu1  ;;  %v1084_v44 = vadd.f32 (!%p1451_p6), %v2239_v37, %v1045_v26  ;;  %1273 = vst.msk [vmem:[%s2082_s29 + $0x30] sm:$0xf] (!%p1451_p6), %vm1260_vm3, %v1500_v38  ;;  %v1127_v24 = vmax.f32 (!%p1451_p6), %v1095_v17, 0.0 }
 0x296   : > { %v990_v33 = vadd.f32 %v1645_v29, %v589_v27  ;;  %v1648_v34 = vadd.f32 %v1647_v32, %v1646_v30  ;;  %v1046_v27 = vld [vmem:[#allocation2 + $0x88] sm:$0xff] (!%p1451_p6)  ;;  %v1497_v29 = vpack.c.bf16 (!%p1451_p6), %v1109_v19, %v1109_v19  ;;  %v1113_v30 = vmax.f32 (!%p1451_p6), %v1081_v20, 0.0  ;;  %v1047_v32 = vld [vmem:[#allocation2 + $0x90] sm:$0xff] (!%p1451_p6)  ;;  %1269 = vst.msk [vmem:[%s2082_s29 + $0x20] sm:$0xf] (!%p1451_p6), %vm1260_vm3, %v1496_v28 }
 0x297   : > { %v1085_v45 = vadd.f32 (!%p1451_p6), %v2239_v37, %v1046_v27  ;;  %v1503_v47 = vpack.c.bf16 (!%p1451_p6), %v1115_v39, %v1115_v39  ;;  %v1086_v48 = vadd.f32 (!%p1451_p6), %v2239_v37, %v1047_v32  ;;  %v1116_v51 = vmax.f32 (!%p1451_p6), %v1084_v44, 0.0  ;;  %v1057_v3 = vld [vmem:[#allocation2 + $0xe0] sm:$0xff] (!%p1451_p6) }
 0x298   : > { %1023 = vst.msk [vmem:[#allocation2 + $0xf0] sm:$0xff] %vm992_vm2, %v990_v33  ;;  %v991_v35 = vadd.f32 %v1648_v34, %v590_v31  ;;  %v1114_v31 = vmax.f32 (!%p1451_p6), %v1082_v21, 0.0  ;;  %v1048_v33 = vld [vmem:[#allocation2 + $0x98] sm:$0xff] (!%p1451_p6)  ;;  %v1049_v34 = vld [vmem:[#allocation2 + $0xa0] sm:$0xff] (!%p1451_p6)  ;;  %v1501_v42 = vpack.c.bf16 (!%p1451_p6), %v1113_v30, %v1113_v30  ;;  %v1096_v18 = vadd.f32 (!%p1451_p6), %v2239_v37, %v1057_v3 }
 0x299   : > { %1270 = vst.msk [vmem:[%s2082_s29 + $0x24] sm:$0xf] (!%p1451_p6), %vm1260_vm3, %v1497_v29  ;;  %v1087_v49 = vadd.f32 (!%p1451_p6), %v2239_v37, %v1048_v33  ;;  %v1088_v50 = vadd.f32 (!%p1451_p6), %v2239_v37, %v1049_v34  ;;  %v1117_v52 = vmax.f32 (!%p1451_p6), %v1085_v45, 0.0  ;;  %1276 = vst.msk [vmem:[%s2082_s29 + $0x3c] sm:$0xf] (!%p1451_p6), %vm1260_vm3, %v1503_v47  ;;  %v1118_v55 = vmax.f32 (!%p1451_p6), %v1086_v48, 0.0 }
 0x29a   : > { %1024 = vst.msk [vmem:[#allocation2 + $0xf8] sm:$0xff] %vm992_vm2, %v991_v35  ;;  %v1498_v35 = vpack.c.bf16 (!%p1451_p6), %v1110_v22, %v1110_v22  ;;  %v1502_v43 = vpack.c.bf16 (!%p1451_p6), %v1114_v31, %v1114_v31  ;;  %v1504_v61 = vpack.c.bf16 (!%p1451_p6), %v1116_v51, %v1116_v51  ;;  %v1058_v8 = vld [vmem:[#allocation2 + $0xe8] sm:$0xff] (!%p1451_p6)  ;;  %v1124_v19 = vmax.f32 (!%p1451_p6), %v1092_v12, 0.0 }
 0x29b   : > { %1274 = vst.msk [vmem:[%s2082_s29 + $0x34] sm:$0xf] %vm1260_vm3, %v1501_v42  ;;  %v1119_v56 = vmax.f32 %v1087_v49, 0.0  ;;  %v1120_v57 = vmax.f32 %v1088_v50, 0.0  ;;  %v1505_v62 = vpack.c.bf16 %v1117_v52, %v1117_v52  ;;  %v1506_v4 = vpack.c.bf16 %v1118_v55, %v1118_v55 }
 0x29c   : > { %1271 = vst.msk [vmem:[%s2082_s29 + $0x28] sm:$0xf] %vm1260_vm3, %v1498_v35  ;;  %1275 = vst.msk [vmem:[%s2082_s29 + $0x38] sm:$0xf] %vm1260_vm3, %v1502_v43  ;;  %v1125_v20 = vmax.f32 %v1093_v13, 0.0  ;;  %v1097_v21 = vadd.f32 %v2239_v37, %v1058_v8  ;;  %v1128_v25 = vmax.f32 %v1096_v18, 0.0  ;;  %v1512_v27 = vpack.c.bf16 %v1124_v19, %v1124_v19 }
 0x29d   : > { %v1507_v5 = vpack.c.bf16 %v1119_v56, %v1119_v56  ;;  %v1508_v6 = vpack.c.bf16 %v1120_v57, %v1120_v57  ;;  %1277 = vst.msk [vmem:[%s2082_s29 + $0x40] sm:$0xf] %vm1260_vm3, %v1504_v61  ;;  %1278 = vst.msk [vmem:[%s2082_s29 + $0x44] sm:$0xf] %vm1260_vm3, %v1505_v62  ;;  %v1514_v31 = vpack.c.bf16 %v1126_v23, %v1126_v23 }
 0x29e   : > { %1279 = vst.msk [vmem:[%s2082_s29 + $0x48] sm:$0xf] %vm1260_vm3, %v1506_v4  ;;  %v1513_v28 = vpack.c.bf16 %v1125_v20, %v1125_v20  ;;  %v1129_v29 = vmax.f32 %v1097_v21, 0.0  ;;  %v1515_v32 = vpack.c.bf16 %v1127_v24, %v1127_v24  ;;  %v1516_v33 = vpack.c.bf16 %v1128_v25, %v1128_v25  ;;  %1285 = vst.msk [vmem:[%s2082_s29 + $0x60] sm:$0xf] %vm1260_vm3, %v1512_v27 }
 0x29f   : > { %v1059_v9 = vld [vmem:[#allocation2 + $0xf0] sm:$0xff]  ;;  %1280 = vst.msk [vmem:[%s2082_s29 + $0x4c] sm:$0xf] %vm1260_vm3, %v1507_v5  ;;  %1281 = vst.msk [vmem:[%s2082_s29 + $0x50] sm:$0xf] %vm1260_vm3, %v1508_v6 }
 0x2a0   : > { %v1098_v22 = vadd.f32 %v2239_v37, %v1059_v9  ;;  %1286 = vst.msk [vmem:[%s2082_s29 + $0x64] sm:$0xf] %vm1260_vm3, %v1513_v28  ;;  %v1517_v35 = vpack.c.bf16 %v1129_v29, %v1129_v29  ;;  %1287 = vst.msk [vmem:[%s2082_s29 + $0x68] sm:$0xf] %vm1260_vm3, %v1514_v31 }
 0x2a1   : > { %v1060_v14 = vld [vmem:[#allocation2 + $0xf8] sm:$0xff]  ;;  %1288 = vst.msk [vmem:[%s2082_s29 + $0x6c] sm:$0xf] %vm1260_vm3, %v1515_v32  ;;  %1289 = vst.msk [vmem:[%s2082_s29 + $0x70] sm:$0xf] %vm1260_vm3, %v1516_v33 }
 0x2a2   : > { %v1099_v26 = vadd.f32 %v2239_v37, %v1060_v14  ;;  %v1130_v30 = vmax.f32 %v1098_v22, 0.0  ;;  %1290 = vst.msk [vmem:[%s2082_s29 + $0x74] sm:$0xf] %vm1260_vm3, %v1517_v35 }
 0x2a4   : > { %v1131_v34 = vmax.f32 %v1099_v26, 0.0  ;;  %v1518_v36 = vpack.c.bf16 %v1130_v30, %v1130_v30 }
 0x2a6   : > { %v1519_v37 = vpack.c.bf16 %v1131_v34, %v1131_v34  ;;  %1291 = vst.msk [vmem:[%s2082_s29 + $0x78] sm:$0xf] %vm1260_vm3, %v1518_v36 }
 0x2a8   : > { %1292 = vst.msk [vmem:[%s2082_s29 + $0x7c] sm:$0xf] %vm1260_vm3, %v1519_v37 }
 0x2a9 PF: > { %s17_s22 = sadd.s32 1, %s1918_s22   ;;  %s2371_s7 = sld [smem:[#allocation6_spill]] }
 0x2aa   : > { %p14_p8 = scmp.ge.s32.totalorder %s17_s22, 6   ;;  %s2372_s15 = smov %s1894_s16 }
 0x2ab   : > { %s2373_s16 = smov %s1898_s17  ;;  %s2374_s17 = smov %s2017_s9 }
 0x2ac   : > { %s2375_s18 = smov %s1910_s20  ;;  %s2376_s19 = smov %s1914_s21 }
 0x2ad   : > { %s2378_s21 = smov %s2384_s25  ;;  %16 = sbr.rel (!%p14_p8) target bundleno = 5 (0x5), region = 87 }
 0x2af   : > { %s2377_s20 = smov %s2371_s7 }
 0x2b4   :  { %1315 = vsyncpa [#allocation4], 1 }
 0x2b5   :  { %1317 = vsyncpa [#allocation4 + $0x1], 1 }

</bundles_post_ra>
